<compile_context>
chip_gen: v6e
topology: v6e:2x2x1
jax: 0.10.0
libtpu: 0.0.40
codegen_flags: <defaults>
</compile_context>

<pallas_src>
import math

import jax
import jax.numpy as jnp
from jax import lax
from jax.experimental import pallas as pl
from jax.experimental.pallas import tpu as pltpu

_INV_SQRT2 = 1.0 / math.sqrt(2.0)


def _bert_gelu(x):
    # BERT's exact gelu: 0.5 * x * (1 + erf(x / sqrt(2)))
    return 0.5 * x * (1.0 + lax.erf(x * _INV_SQRT2))


def _round_up(x, m):
    return ((x + m - 1) // m) * m


def _device_vmem_budget():
    """Usable per-core VMEM budget in bytes (physical capacity minus headroom)."""
    try:
        cap = int(pltpu.get_tpu_info().vmem_capacity_bytes)
    except Exception:
        cap = 64 << 20  # conservative: v7x has 64 MiB per TensorCore
    return max(16 << 20, cap - (8 << 20))


# ----------------------------------------------------------------------------
# Kernel A (default): weight fully resident in VMEM, 2-D grid (M tiles, I tiles)
# ----------------------------------------------------------------------------
def _resident_kernel(x_ref, w_ref, b_ref, o_ref):
    # x_ref: [tm, H]      (activation tile, held across the inner j axis)
    # w_ref: [Ip, H]      (FULL weight, PyTorch layout, constant index -> 1 DMA)
    # b_ref: [1, tn]      (bias panel, f32)
    # o_ref: [tm, tn]
    j = pl.program_id(1)
    tn = o_ref.shape[1]
    row0 = pl.multiple_of(j * tn, tn)
    w_tile = w_ref[pl.ds(row0, tn), :]                       # [tn, H]
    res = lax.dot_general(
        x_ref[...], w_tile,
        dimension_numbers=(((1,), (1,)), ((), ())),          # NT: contract H
        preferred_element_type=jnp.float32,
    )
    res = res + b_ref[...].astype(jnp.float32)               # broadcast [1,tn]
    o_ref[...] = _bert_gelu(res).astype(o_ref.dtype)


# ----------------------------------------------------------------------------
# Kernel B (fallback): streamed W panels, 3-D grid (M, I, K) with K innermost
# ----------------------------------------------------------------------------
def _streaming_kernel(x_ref, w_ref, b_ref, o_ref, acc_ref):
    k = pl.program_id(2)
    nk = pl.num_programs(2)

    part = lax.dot_general(
        x_ref[...], w_ref[...],
        dimension_numbers=(((1,), (1,)), ((), ())),
        preferred_element_type=jnp.float32,
    )

    @pl.when(k == 0)
    def _():
        acc_ref[...] = jnp.broadcast_to(
            b_ref[...].astype(jnp.float32), acc_ref.shape)

    @pl.when(k < nk - 1)
    def _():
        acc_ref[...] += part

    @pl.when(k == nk - 1)
    def _():
        # Final K step: fuse the last partial product, bias is already in acc.
        # No store-then-reload of the scratch on the last step.
        o_ref[...] = _bert_gelu(acc_ref[...] + part).astype(o_ref.dtype)


# ----------------------------------------------------------------------------
# Wrapper
# ----------------------------------------------------------------------------
def bert_intermediate(
    hidden_states,          # [B, S, H]
    dense_weight,           # [I, H]  (PyTorch F.linear layout)
    dense_bias,             # [I]
    *,
    tm=512,
    tn=1024,
    tk=512,                 # only used by the streaming fallback
    compute_dtype=None,     # default: bf16 MXU operands when input is f32
    force_streaming=False,  # testing hook
):
    """Returns gelu(hidden_states @ W^T + b) with shape [B, S, I]."""
    B, S, H = hidden_states.shape
    I = dense_weight.shape[0]
    M = B * S
    out_dtype = hidden_states.dtype

    if compute_dtype is None:
        # bf16 operands + f32 accumulation: ~4-8x MXU throughput and half the
        # DMA bytes vs f32 operands; pass jnp.float32 for an exact path.
        compute_dtype = (jnp.bfloat16 if hidden_states.dtype == jnp.float32
                         else hidden_states.dtype)

    cb = jnp.dtype(compute_dtype).itemsize
    ob = jnp.dtype(out_dtype).itemsize
    budget = _device_vmem_budget()

    # M tile: multiple of 16 (covers bf16 sublane packing), clamped to problem.
    tm = _round_up(max(16, min(tm, M)), 16)

    # Ragged M is handled by a cdiv grid + masked partial blocks (no x copy).
    grid_i = pl.cdiv(M, tm)

    # For inference you would cache the casted weight/bias outside this call.
    x2d = hidden_states.reshape(M, H).astype(compute_dtype)
    w = dense_weight.astype(compute_dtype)          # keep [I, H]; no transpose
    b2d = dense_bias.reshape(1, I).astype(jnp.float32)

    # ---- Plan A: full weight resident in VMEM -----------------------------
    tn_res = _round_up(max(128, min(tn, I)), 128)
    Ip_res = _round_up(I, tn_res)
    est_resident = (
        2 * Ip_res * H * cb        # W block (double-buffered by the pipeline)
        + 2 * tm * H * cb          # x tile
        + 2 * tm * tn_res * ob     # out tile
        + 2 * tn_res * 4           # bias tile
        + (2 << 20)                # Mosaic internal scratch headroom
    )
    use_resident = (not force_streaming) and (est_resident <= budget)

    if use_resident:
        if Ip_res != I:
            # Only the (small) weight / bias are padded; the activation and
            # output are never copied for padding.
            w = jnp.pad(w, ((0, Ip_res - I), (0, 0)))
            b2d = jnp.pad(b2d, ((0, 0), (0, Ip_res - I)))

        grid = (grid_i, Ip_res // tn_res)
        vmem_limit = int(min(budget,
                             max(16 << 20, int(est_resident * 1.3) + (2 << 20))))

        out = pl.pallas_call(
            _resident_kernel,
            out_shape=jax.ShapeDtypeStruct((M, I), out_dtype),
            grid_spec=pltpu.PrefetchScalarGridSpec(
                num_scalar_prefetch=0,
                grid=grid,
                in_specs=[
                    # x tile: index constant along inner j axis -> loaded once per i.
                    pl.BlockSpec((tm, H), lambda i, j: (i, 0)),
                    # Full weight, constant index -> single HBM read, stays in VMEM.
                    pl.BlockSpec((Ip_res, H), lambda i, j: (0, 0)),
                    # Bias panel.
                    pl.BlockSpec((1, tn_res), lambda i, j: (0, j)),
                ],
                out_specs=pl.BlockSpec((tm, tn_res), lambda i, j: (i, j)),
            ),
            compiler_params=pltpu.CompilerParams(
                # Both axes independent -> v7x can split (i, j) blocks across
                # its two TensorCores.
                dimension_semantics=("parallel", "parallel"),
                vmem_limit_bytes=vmem_limit,
            ),
        )(x2d, w, b2d)
        return out.reshape(B, S, I)

    # ---- Plan B: stream W panels with a K reduction axis -------------------
    # Larger tm keeps the kernel compute-bound even though W is re-streamed.
    tm_s = _round_up(max(16, min(max(tm, 1024), M)), 16)
    grid_i_s = pl.cdiv(M, tm_s)
    tn_s = _round_up(max(128, min(min(tn, 512), I)), 128)
    Ip_s = _round_up(I, tn_s)

    # Pick tk as the largest multiple of 128 that divides Hp and is <= target,
    # so the padded contraction length is just round_up(H, 128).
    Hp = _round_up(H, 128)
    units = Hp // 128
    tk_units = 1
    target = max(128, tk)
    for d in range(1, units + 1):
        if units % d == 0 and d * 128 <= target:
            tk_units = d
    tk_s = tk_units * 128
    nk = Hp // tk_s

    if Hp != H:
        # Zero-pad the contraction dim (required for correctness when blocked).
        x2d = jnp.pad(x2d, ((0, 0), (0, Hp - H)))
        w = jnp.pad(w, ((0, 0), (0, Hp - H)))
    if Ip_s != I:
        w = jnp.pad(w, ((0, Ip_s - I), (0, 0)))
        b2d = jnp.pad(b2d, ((0, 0), (0, Ip_s - I)))

    est_stream = (
        2 * tm_s * tk_s * cb + 2 * tn_s * tk_s * cb
        + 2 * tm_s * tn_s * ob + tm_s * tn_s * 4 + 2 * tn_s * 4 + (2 << 20)
    )
    vmem_limit = int(min(budget, max(16 << 20, int(est_stream * 1.3) + (2 << 20))))

    grid = (grid_i_s, Ip_s // tn_s, nk)
    out = pl.pallas_call(
        _streaming_kernel,
        out_shape=jax.ShapeDtypeStruct((M, I), out_dtype),
        grid_spec=pltpu.PrefetchScalarGridSpec(
            num_scalar_prefetch=0,
            grid=grid,
            in_specs=[
                pl.BlockSpec((tm_s, tk_s), lambda i, j, k: (i, k)),  # x tile
                pl.BlockSpec((tn_s, tk_s), lambda i, j, k: (j, k)),  # W panel
                pl.BlockSpec((1, tn_s), lambda i, j, k: (0, j)),     # bias
            ],
            out_specs=pl.BlockSpec((tm_s, tn_s), lambda i, j, k: (i, j)),
            scratch_shapes=[pltpu.VMEM((tm_s, tn_s), jnp.float32)],
        ),
        compiler_params=pltpu.CompilerParams(
            dimension_semantics=("parallel", "parallel", "arbitrary"),
            vmem_limit_bytes=vmem_limit,
        ),
    )(x2d, w, b2d)
    return out.reshape(B, S, I)


if __name__ == "__main__":
    # Small, BERT-like synthetic config: hidden=32, intermediate=128
    B, S, H, I = 2, 8, 32, 128

    key = jax.random.PRNGKey(0)
    kx, kw, kb, kx2, kw2, kb2 = jax.random.split(key, 6)
    hidden_states = jax.random.normal(kx, (B, S, H), dtype=jnp.float32)
    dense_weight = jax.random.normal(kw, (I, H), dtype=jnp.float32) * 0.02
    dense_bias = jax.random.normal(kb, (I,), dtype=jnp.float32) * 0.02

    # Reference: plain JAX F.linear + exact gelu
    ref = _bert_gelu(
        jnp.einsum("bsh,ih->bsi", hidden_states, dense_weight) + dense_bias
    )

    # Default path: bf16 MXU operands / f32 accumulation, weight-resident.
    out = jax.block_until_ready(
        bert_intermediate(hidden_states, dense_weight, dense_bias))
    assert out.shape == (B, S, I)
    assert jnp.allclose(out, ref, atol=2e-2, rtol=2e-2)

    # Exact f32 path.
    out_f32 = jax.block_until_ready(
        bert_intermediate(hidden_states, dense_weight, dense_bias,
                          compute_dtype=jnp.float32))
    assert jnp.allclose(out_f32, ref, atol=1e-5, rtol=1e-5)

    # Streaming fallback (multi-step K reduction) on a ragged shape.
    B2, S2, H2, I2 = 2, 12, 256, 384
    hs2 = jax.random.normal(kx2, (B2, S2, H2), dtype=jnp.float32)
    w2 = jax.random.normal(kw2, (I2, H2), dtype=jnp.float32) * 0.02
    b2 = jax.random.normal(kb2, (I2,), dtype=jnp.float32) * 0.02
    ref2 = _bert_gelu(jnp.einsum("bsh,ih->bsi", hs2, w2) + b2)
    out2 = jax.block_until_ready(
        bert_intermediate(hs2, w2, b2, compute_dtype=jnp.float32,
                          force_streaming=True, tk=128))
    assert out2.shape == (B2, S2, I2)
    assert jnp.allclose(out2, ref2, atol=1e-4, rtol=1e-4)

    print("KERNEL_OK")
</pallas_src>

<mosaic_0001>
module attributes {stable_mosaic.version = 11 : i64} {
  func.func @_resident_kernel(%arg0: i32, %arg1: i32, %arg2: memref<16x32xbf16, #tpu.memory_space<vmem>>, %arg3: memref<128x32xbf16, #tpu.memory_space<vmem>>, %arg4: memref<1x128xf32, #tpu.memory_space<vmem>>, %arg5: memref<16x128xf32, #tpu.memory_space<vmem>>) attributes {dimension_semantics = [#tpu.dimension_semantics<parallel>, #tpu.dimension_semantics<parallel>], iteration_bounds = array<i64: 1, 1>, scalar_prefetch = 0 : i64, scratch_operands = 0 : i64, tpu.core_type = #tpu.core_type<tc>, window_params = [{transform_indices = @transform_0, window_bounds = array<i64: 16, 32>}, {pipeline_mode = #tpu.pipeline_mode<synchronous>, transform_indices = @transform_1, window_bounds = array<i64: 128, 32>}, {transform_indices = @transform_2, window_bounds = array<i64: 1, 128>}, {transform_indices = @transform_3, window_bounds = array<i64: 16, 128>}]} {
    %c128_i32 = arith.constant 128 : i32
    %0 = arith.muli %arg1, %c128_i32 : i32
    %1 = tpu.assume_multiple %0, 128 : i32
    %2 = arith.index_cast %1 : i32 to index
    %c0 = arith.constant 0 : index
    %3 = vector.load %arg3[%2, %c0] : memref<128x32xbf16, #tpu.memory_space<vmem>>, vector<128x32xbf16>
    %c0_0 = arith.constant 0 : index
    %c0_1 = arith.constant 0 : index
    %4 = vector.load %arg2[%c0_0, %c0_1] : memref<16x32xbf16, #tpu.memory_space<vmem>>, vector<16x32xbf16>
    %cst = arith.constant dense<0.000000e+00> : vector<16x128xf32>
    %5 = tpu.matmul %4, %3, %cst {dimension_numbers = #tpu.dot_dimension_numbers<[1], [1], [0], [0], [0, 0, 1, 0], [], []>} : vector<16x32xbf16>, vector<128x32xbf16>, vector<16x128xf32> -> vector<16x128xf32>
    %c0_2 = arith.constant 0 : index
    %c0_3 = arith.constant 0 : index
    %6 = vector.load %arg4[%c0_2, %c0_3] : memref<1x128xf32, #tpu.memory_space<vmem>>, vector<1x128xf32>
    %7 = vector.broadcast %6 : vector<1x128xf32> to vector<16x128xf32>
    %8 = arith.addf %5, %7 : vector<16x128xf32>
    %cst_4 = arith.constant 5.000000e-01 : f32
    %9 = vector.broadcast %cst_4 : f32 to vector<16x128xf32>
    %10 = arith.mulf %9, %8 : vector<16x128xf32>
    %cst_5 = arith.constant 0.707106769 : f32
    %11 = vector.broadcast %cst_5 : f32 to vector<16x128xf32>
    %12 = arith.mulf %8, %11 : vector<16x128xf32>
    %13 = math.erf %12 : vector<16x128xf32>
    %cst_6 = arith.constant 1.000000e+00 : f32
    %14 = vector.broadcast %cst_6 : f32 to vector<16x128xf32>
    %15 = arith.addf %14, %13 : vector<16x128xf32>
    %16 = arith.mulf %10, %15 : vector<16x128xf32>
    %c0_7 = arith.constant 0 : index
    %c0_8 = arith.constant 0 : index
    %17 = vector.load %arg5[%c0_7, %c0_8] : memref<16x128xf32, #tpu.memory_space<vmem>>, vector<16x128xf32>
    tpu.vector_store %arg5[%c0_7, %c0_8], %16 {strides = array<i32>} : memref<16x128xf32, #tpu.memory_space<vmem>>, vector<16x128xf32>,
    return
  }
  func.func @transform_0(%arg0: i32, %arg1: i32) -> (i32, i32) {
    %c0_i32 = arith.constant 0 : i32
    %c0_i32_0 = arith.constant 0 : i32
    return %arg0, %c0_i32 : i32, i32
  }
  func.func @transform_1(%arg0: i32, %arg1: i32) -> (i32, i32) {
    %c0_i32 = arith.constant 0 : i32
    %c0_i32_0 = arith.constant 0 : i32
    %c0_i32_1 = arith.constant 0 : i32
    return %c0_i32, %c0_i32_0 : i32, i32
  }
  func.func @transform_2(%arg0: i32, %arg1: i32) -> (i32, i32) {
    %c0_i32 = arith.constant 0 : i32
    %c0_i32_0 = arith.constant 0 : i32
    return %c0_i32, %arg1 : i32, i32
  }
  func.func @transform_3(%arg0: i32, %arg1: i32) -> (i32, i32) {
    %c0_i32 = arith.constant 0 : i32
    return %arg0, %arg1 : i32, i32
  }
}

</mosaic_0001>

<bundles_post_ra>
// kernel: tpu_custom_call.1
= control target key start
LH: loop header
LB: loop body
LE: loop exit
PB: predicated region body
PF: predicated region fallthrough
CT: control target
= control target key end

     0   :  { %v270_v1 = vmov 0.0   ;;  %vm91_vm0 = vcmask 261120   ;;  %vm271_vm1 = vmmov 0   ;;  %s337_s0 = inlined_call_operand.vmem [shape: bf16[16,32], index: 0, kind: input, shape index: {}]   ;;  %s338_s1 = inlined_call_operand.vmem [shape: bf16[128,32], index: 1, kind: input, shape index: {}]   ;;  %s339_s2 = inlined_call_operand.vmem [shape: f32[1,128], index: 2, kind: input, shape index: {}]   ;;  %s340_s3 = inlined_call_operand.hbm [shape: f32[16,128], index: 3, kind: output, shape index: {}]  }
   0x1   :  { %v235_v0 = vld [vmem:[%s338_s1 + $0x38] sm:$0xff]   ;;  %210 = vmatprep.subr.bf16.mxu0 %v270_v1  ;;  %v236_v3 = vld [vmem:[%s338_s1 + $0x30] sm:$0xff]   ;;  %226 = vmatprep.mubr.msk.bf16.mxu0 %vm271_vm1, %v270_v1 }
   0x2   :  { %v117_v2 = vsel %vm91_vm0, %v235_v0, 0  ;;  %v114_v4 = vsel %vm91_vm0, %v236_v3, 0 }
   0x3   :  { %211 = vmatpush3.bf16.xpose.msra.mxu0 %v117_v2 }
   0x4   :  { %212 = vmatprep.subr.bf16.mxu0 %v270_v1 }
   0x5   :  { %8 = vsyncpa [#allocation3], 0  ;;  %v237_v5 = vld [vmem:[%s338_s1 + $0x28] sm:$0xff]   ;;  %v238_v7 = vld [vmem:[%s338_s1 + $0x20] sm:$0xff]  }
   0x6   :  { %v111_v6 = vsel %vm91_vm0, %v237_v5, 0  ;;  %v108_v8 = vsel %vm91_vm0, %v238_v7, 0  ;;  %v239_v9 = vld [vmem:[%s338_s1 + $0x18] sm:$0xff]   ;;  %v240_v11 = vld [vmem:[%s338_s1 + $0x10] sm:$0xff]   ;;  %v241_v13 = vld [vmem:[%s338_s1 + $0x8] sm:$0xff]  }
   0x7   :  { %v105_v10 = vsel %vm91_vm0, %v239_v9, 0  ;;  %v102_v12 = vsel %vm91_vm0, %v240_v11, 0  ;;  %v99_v14 = vsel %vm91_vm0, %v241_v13, 0  ;;  %v242_v15 = vld [vmem:[%s338_s1] sm:$0xff]  }
   0x8   :  { %v96_v16 = vsel %vm91_vm0, %v242_v15, 0  ;;  %v243_v17 = vld [vmem:[%s337_s0] sm:$0xff]   ;;  %s272_s0 = smov [#allocation2]  }
   0x9   :  { %v190_v18 = vld [vmem:[%s339_s2] ss:$0 sm:$0xff]  ;;  %s177_s1 = sshll.u32 %s272_s0, 4  ;;  %s178_s1 = int_to_ptr.vmem [resolvable:$true] %s177_s1 }
   0xa   :  { %s248_s2 = scalar_lea.vmem %s178_s1, 256  ;;  %p253_p1 = scmp.lt.s32.totalorder %s178_s1, %s178_s1 }
   0xb   :  { %213 = vmatpush3.bf16.xpose.msra.mxu0 %v114_v4  ;;  %p249_p0 = scmp.ne.s32.totalorder %s178_s1, %s248_s2  ;;  %p254_p2 = scmp.lt.s32.totalorder %s248_s2, %s248_s2 }
   0xc   :  { %214 = vmatprep.subr.bf16.mxu0 %v270_v1 }
   0xd   :  { %p255_p3 = por %p254_p2, %p253_p1 }
   0xf   :  { %p256_p4 = pnand %p255_p3, %p249_p0 }
  0x13   :  { %215 = vmatpush3.bf16.xpose.msra.mxu0 %v111_v6 }
  0x14   :  { %216 = vmatprep.subr.bf16.mxu0 %v270_v1 }
  0x1b   :  { %217 = vmatpush3.bf16.xpose.msra.mxu0 %v108_v8 }
  0x1c   :  { %218 = vmatprep.subr.bf16.mxu0 %v270_v1 }
  0x23   :  { %219 = vmatpush3.bf16.xpose.msra.mxu0 %v105_v10 }
  0x24   :  { %220 = vmatprep.subr.bf16.mxu0 %v270_v1 }
  0x2b   :  { %221 = vmatpush3.bf16.xpose.msra.mxu0 %v102_v12 }
  0x2c   :  { %222 = vmatprep.subr.bf16.mxu0 %v270_v1 }
  0x33   :  { %223 = vmatpush3.bf16.xpose.msra.mxu0 %v99_v14 }
  0x34   :  { %224 = vmatprep.subr.bf16.mxu0 %v270_v1 }
  0x3b   :  { %225 = vmatpush3.bf16.xpose.msra.mxu0 %v96_v16 }
  0x42   :  { %227 = vmatmul.mubr.msk.bf16.vlgmr.msra.gmra.mxu0 %vm91_vm0, %v243_v17 }
 0x102   :  { %v153_v19 = vpop.f32.mrf.mxu0 }
 0x103   :  { %v154_v20 = vadd.f32 %v190_v18, %v153_v19 }
 0x104   :  { %v228_v21 = vpop.f32.mrf.mxu0 }
 0x105   :  { %v162_v22 = vmul.f32 0.70710677, %v154_v20  ;;  %v160_v28 = vmul.f32 0.5, %v154_v20 }
 0x106   :  { %v156_v23 = vpop.f32.mrf.mxu0 }
 0x107   :  { %244 = verf.f32 %v162_v22  ;;  %v157_v24 = vadd.f32 %v190_v18, %v156_v23 }
 0x108   :  { %v229_v25 = vpop.f32.mrf.mxu0 }
 0x109   :  { %v163_v26 = vmul.f32 0.70710677, %v157_v24  ;;  %v161_v32 = vmul.f32 0.5, %v157_v24 }
 0x10b   :  { %246 = verf.f32 %v163_v26 }
 0x114   :  { %v245_v27 = vpop.eup %244 }
 0x115   :  { %v166_v29 = vadd.f32 1.0, %v245_v27 }
 0x117   :  { %v168_v30 = vmul.f32 %v166_v29, %v160_v28 }
 0x118   :  { %v247_v31 = vpop.eup %246 }
 0x119   :  { %170 = vst [vmem:[#allocation2] sm:$0xff] %v168_v30  ;;  %v167_v33 = vadd.f32 1.0, %v247_v31 }
 0x11b   :  { %v169_v34 = vmul.f32 %v167_v33, %v161_v32 }
 0x11d   :  { %171 = vst [vmem:[#allocation2 + $0x8] sm:$0xff] %v169_v34 }
 0x11e   :  { %259 = shalt.err (!%p256_p4)
}
 0x11f   :  { %s273_s5 = smov 128   ;;  %s274_s6 = smov 8  }
 0x120   :  { %183 = dma.vmem_to_hbm [thread:$0]  %s178_s1, 256, %s340_s3, [#allocation3], %s273_s5, %s273_s5, %s274_s6  }
 0x121   :  { %268 = dma.done.wait [#allocation3], 256  }
 0x122   :  { %269 = vsyncadd [#allocation3], 4294967040 }
 0x123   :  { %187 = vsyncpa [#allocation3], 1 }

</bundles_post_ra>
